<compile_context>
chip_gen: v7x
topology: tpu7x:2x2x1
jax: 0.10.0
libtpu: 0.0.40
codegen_flags: <defaults>
</compile_context>

<pallas_src>
import functools

import jax
import jax.numpy as jnp
from jax.experimental import pallas as pl
from jax.experimental.pallas import tpu as pltpu

D_IN, D_HID, D_OUT = 784, 100, 10       # logical sizes (match nn.Linear spec)
DP_IN, DP_HID, DP_OUT = 896, 128, 128   # lane-padded sizes (multiples of 128)


def mlp_kernel(x_ref, w1_ref, b1_ref, w2_ref, b2_ref, w3_ref, b3_ref, o_ref):
    # Layer 1: (TB,896)bf16 @ (896,128)bf16 -> f32 acc, +bias, ReLU
    h = jnp.dot(x_ref[...], w1_ref[...], preferred_element_type=jnp.float32)
    h = jnp.maximum(h + b1_ref[...], 0.0)
    # Layer 2: (TB,128) @ (128,128), bf16 operands, f32 acc, +bias, ReLU
    h = jnp.dot(h.astype(jnp.bfloat16), w2_ref[...], preferred_element_type=jnp.float32)
    h = jnp.maximum(h + b2_ref[...], 0.0)
    # Layer 3 (logits, no activation): (TB,128) @ (128,128), f32 output block
    o_ref[...] = (
        jnp.dot(h.astype(jnp.bfloat16), w3_ref[...], preferred_element_type=jnp.float32)
        + b3_ref[...]
    )


def _pad2(a, rows, cols, dtype):
    """Zero-pad a 2-D array to (rows, cols) and cast."""
    r, c = a.shape
    return jnp.pad(a, ((0, rows - r), (0, cols - c))).astype(dtype)


def prep_kernel_params(params):
    """Pad/cast PyTorch-layout params to the lane-padded kernel layout."""
    w1, b1, w2, b2, w3, b3 = params
    w1p = _pad2(w1, DP_IN, DP_HID, jnp.bfloat16)
    w2p = _pad2(w2, DP_HID, DP_HID, jnp.bfloat16)
    w3p = _pad2(w3, DP_HID, DP_OUT, jnp.bfloat16)
    b1p = _pad2(b1, 1, DP_HID, jnp.float32)
    b2p = _pad2(b2, 1, DP_HID, jnp.float32)
    b3p = _pad2(b3, 1, DP_OUT, jnp.float32)
    return w1p, b1p, w2p, b2p, w3p, b3p


@functools.partial(jax.jit, static_argnames=("tb",))
def mynn_forward(x, params, *, tb=256):
    """x: (B, 784) float32.  params: PyTorch-layout (in,out) weights + (1,out) biases."""
    B = x.shape[0]
    w1p, b1p, w2p, b2p, w3p, b3p = prep_kernel_params(params)

    # Pick a batch tile: multiple of 8 sublanes, capped at `tb`; pad B up to a multiple.
    tile_b = min(tb, ((B + 7) // 8) * 8)
    Bp = ((B + tile_b - 1) // tile_b) * tile_b
    xp = jnp.pad(x, ((0, Bp - B), (0, DP_IN - D_IN))).astype(jnp.bfloat16)

    grid = (Bp // tile_b,)
    const = lambda i: (0, 0)  # weights / biases stay resident across batch tiles

    out = pl.pallas_call(
        mlp_kernel,
        out_shape=jax.ShapeDtypeStruct((Bp, DP_OUT), jnp.float32),
        grid=grid,
        in_specs=[
            pl.BlockSpec((tile_b, DP_IN), lambda i: (i, 0)),   # x tile
            pl.BlockSpec((DP_IN, DP_HID), const),              # w1
            pl.BlockSpec((1, DP_HID), const),                  # b1
            pl.BlockSpec((DP_HID, DP_HID), const),             # w2
            pl.BlockSpec((1, DP_HID), const),                  # b2
            pl.BlockSpec((DP_HID, DP_OUT), const),             # w3
            pl.BlockSpec((1, DP_OUT), const),                  # b3
        ],
        out_specs=pl.BlockSpec((tile_b, DP_OUT), lambda i: (i, 0)),
        compiler_params=pltpu.CompilerParams(
            dimension_semantics=("parallel",),
        ),
    )(xp, w1p, b1p, w2p, b2p, w3p, b3p)

    # Drop batch padding and the zero-padded logit columns.
    return out[:B, :D_OUT]


def init_params(key):
    # Mirrors nn.Linear default init: U(-1/sqrt(fan_in), 1/sqrt(fan_in)) for W and b.
    def linear(key, fan_in, fan_out):
        kw, kb = jax.random.split(key)
        bound = 1.0 / jnp.sqrt(fan_in)
        w = jax.random.uniform(kw, (fan_in, fan_out), jnp.float32, -bound, bound)
        b = jax.random.uniform(kb, (1, fan_out), jnp.float32, -bound, bound)
        return w, b

    k1, k2, k3 = jax.random.split(key, 3)
    w1, b1 = linear(k1, D_IN, D_HID)
    w2, b2 = linear(k2, D_HID, D_HID)
    w3, b3 = linear(k3, D_HID, D_OUT)
    return (w1, b1, w2, b2, w3, b3)


def mynn_reference(x, params):
    """Plain-JAX reference with the same bf16-in / f32-accumulate numerics."""
    w1, b1, w2, b2, w3, b3 = params
    h = jnp.dot(x.astype(jnp.bfloat16), w1.astype(jnp.bfloat16),
                preferred_element_type=jnp.float32) + b1
    h = jnp.maximum(h, 0.0)
    h = jnp.dot(h.astype(jnp.bfloat16), w2.astype(jnp.bfloat16),
                preferred_element_type=jnp.float32) + b2
    h = jnp.maximum(h, 0.0)
    return jnp.dot(h.astype(jnp.bfloat16), w3.astype(jnp.bfloat16),
                   preferred_element_type=jnp.float32) + b3


if __name__ == "__main__":
    key = jax.random.PRNGKey(0)
    kx, kp = jax.random.split(key)

    B = 8  # small demo batch; kernel tiles/pipelines larger batches via the grid
    x = jax.random.normal(kx, (B, D_IN), jnp.float32)
    params = init_params(kp)

    out = mynn_forward(x, params)
    jax.block_until_ready(out)

    ref = mynn_reference(x, params)
    assert out.shape == (B, D_OUT)
    assert jnp.allclose(out, ref, atol=1e-2, rtol=1e-2), (
        float(jnp.max(jnp.abs(out - ref))))

    print("KERNEL_OK")
</pallas_src>

<mosaic_0001>
module attributes {stable_mosaic.version = 11 : i64} {
  func.func @mlp_kernel(%arg0: i32, %arg1: memref<8x896xbf16, #tpu.memory_space<vmem>>, %arg2: memref<896x128xbf16, #tpu.memory_space<vmem>>, %arg3: memref<1x128xf32, #tpu.memory_space<vmem>>, %arg4: memref<128x128xbf16, #tpu.memory_space<vmem>>, %arg5: memref<1x128xf32, #tpu.memory_space<vmem>>, %arg6: memref<128x128xbf16, #tpu.memory_space<vmem>>, %arg7: memref<1x128xf32, #tpu.memory_space<vmem>>, %arg8: memref<8x128xf32, #tpu.memory_space<vmem>>) attributes {dimension_semantics = [#tpu.dimension_semantics<parallel>], iteration_bounds = array<i64: 1>, scalar_prefetch = 0 : i64, scratch_operands = 0 : i64, tpu.core_type = #tpu.core_type<tc>, window_params = [{transform_indices = @transform_0, window_bounds = array<i64: 8, 896>}, {pipeline_mode = #tpu.pipeline_mode<synchronous>, transform_indices = @transform_1, window_bounds = array<i64: 896, 128>}, {pipeline_mode = #tpu.pipeline_mode<synchronous>, transform_indices = @transform_2, window_bounds = array<i64: 1, 128>}, {pipeline_mode = #tpu.pipeline_mode<synchronous>, transform_indices = @transform_3, window_bounds = array<i64: 128, 128>}, {pipeline_mode = #tpu.pipeline_mode<synchronous>, transform_indices = @transform_4, window_bounds = array<i64: 1, 128>}, {pipeline_mode = #tpu.pipeline_mode<synchronous>, transform_indices = @transform_5, window_bounds = array<i64: 128, 128>}, {pipeline_mode = #tpu.pipeline_mode<synchronous>, transform_indices = @transform_6, window_bounds = array<i64: 1, 128>}, {transform_indices = @transform_7, window_bounds = array<i64: 8, 128>}]} {
    %c0 = arith.constant 0 : index
    %c0_0 = arith.constant 0 : index
    %0 = vector.load %arg1[%c0, %c0_0] : memref<8x896xbf16, #tpu.memory_space<vmem>>, vector<8x896xbf16>
    %c0_1 = arith.constant 0 : index
    %c0_2 = arith.constant 0 : index
    %1 = vector.load %arg2[%c0_1, %c0_2] : memref<896x128xbf16, #tpu.memory_space<vmem>>, vector<896x128xbf16>
    %cst = arith.constant dense<0.000000e+00> : vector<8x128xf32>
    %2 = tpu.matmul %0, %1, %cst {dimension_numbers = #tpu.dot_dimension_numbers<[1], [0], [0], [1], [0, 0, 1, 1], [], []>} : vector<8x896xbf16>, vector<896x128xbf16>, vector<8x128xf32> -> vector<8x128xf32>
    %c0_3 = arith.constant 0 : index
    %c0_4 = arith.constant 0 : index
    %3 = vector.load %arg3[%c0_3, %c0_4] : memref<1x128xf32, #tpu.memory_space<vmem>>, vector<1x128xf32>
    %4 = vector.broadcast %3 : vector<1x128xf32> to vector<8x128xf32>
    %5 = arith.addf %2, %4 : vector<8x128xf32>
    %cst_5 = arith.constant 0.000000e+00 : f32
    %6 = vector.broadcast %cst_5 : f32 to vector<8x128xf32>
    %7 = arith.maximumf %5, %6 : vector<8x128xf32>
    %8 = arith.truncf %7 : vector<8x128xf32> to vector<8x128xbf16>
    %c0_6 = arith.constant 0 : index
    %c0_7 = arith.constant 0 : index
    %9 = vector.load %arg4[%c0_6, %c0_7] : memref<128x128xbf16, #tpu.memory_space<vmem>>, vector<128x128xbf16>
    %cst_8 = arith.constant dense<0.000000e+00> : vector<8x128xf32>
    %10 = tpu.matmul %8, %9, %cst_8 {dimension_numbers = #tpu.dot_dimension_numbers<[1], [0], [0], [1], [0, 0, 1, 1], [], []>} : vector<8x128xbf16>, vector<128x128xbf16>, vector<8x128xf32> -> vector<8x128xf32>
    %c0_9 = arith.constant 0 : index
    %c0_10 = arith.constant 0 : index
    %11 = vector.load %arg5[%c0_9, %c0_10] : memref<1x128xf32, #tpu.memory_space<vmem>>, vector<1x128xf32>
    %12 = vector.broadcast %11 : vector<1x128xf32> to vector<8x128xf32>
    %13 = arith.addf %10, %12 : vector<8x128xf32>
    %cst_11 = arith.constant 0.000000e+00 : f32
    %14 = vector.broadcast %cst_11 : f32 to vector<8x128xf32>
    %15 = arith.maximumf %13, %14 : vector<8x128xf32>
    %16 = arith.truncf %15 : vector<8x128xf32> to vector<8x128xbf16>
    %c0_12 = arith.constant 0 : index
    %c0_13 = arith.constant 0 : index
    %17 = vector.load %arg6[%c0_12, %c0_13] : memref<128x128xbf16, #tpu.memory_space<vmem>>, vector<128x128xbf16>
    %cst_14 = arith.constant dense<0.000000e+00> : vector<8x128xf32>
    %18 = tpu.matmul %16, %17, %cst_14 {dimension_numbers = #tpu.dot_dimension_numbers<[1], [0], [0], [1], [0, 0, 1, 1], [], []>} : vector<8x128xbf16>, vector<128x128xbf16>, vector<8x128xf32> -> vector<8x128xf32>
    %c0_15 = arith.constant 0 : index
    %c0_16 = arith.constant 0 : index
    %19 = vector.load %arg7[%c0_15, %c0_16] : memref<1x128xf32, #tpu.memory_space<vmem>>, vector<1x128xf32>
    %20 = vector.broadcast %19 : vector<1x128xf32> to vector<8x128xf32>
    %21 = arith.addf %18, %20 : vector<8x128xf32>
    %c0_17 = arith.constant 0 : index
    %c0_18 = arith.constant 0 : index
    %22 = vector.load %arg8[%c0_17, %c0_18] : memref<8x128xf32, #tpu.memory_space<vmem>>, vector<8x128xf32>
    tpu.vector_store %arg8[%c0_17, %c0_18], %21 {strides = array<i32>} : memref<8x128xf32, #tpu.memory_space<vmem>>, vector<8x128xf32>,
    return
  }
  func.func @transform_0(%arg0: i32) -> (i32, i32) {
    %c0_i32 = arith.constant 0 : i32
    %c0_i32_0 = arith.constant 0 : i32
    return %arg0, %c0_i32 : i32, i32
  }
  func.func @transform_1(%arg0: i32) -> (i32, i32) {
    %c0_i32 = arith.constant 0 : i32
    %c0_i32_0 = arith.constant 0 : i32
    %c0_i32_1 = arith.constant 0 : i32
    return %c0_i32, %c0_i32_0 : i32, i32
  }
  func.func @transform_2(%arg0: i32) -> (i32, i32) {
    %c0_i32 = arith.constant 0 : i32
    %c0_i32_0 = arith.constant 0 : i32
    %c0_i32_1 = arith.constant 0 : i32
    return %c0_i32, %c0_i32_0 : i32, i32
  }
  func.func @transform_3(%arg0: i32) -> (i32, i32) {
    %c0_i32 = arith.constant 0 : i32
    %c0_i32_0 = arith.constant 0 : i32
    %c0_i32_1 = arith.constant 0 : i32
    return %c0_i32, %c0_i32_0 : i32, i32
  }
  func.func @transform_4(%arg0: i32) -> (i32, i32) {
    %c0_i32 = arith.constant 0 : i32
    %c0_i32_0 = arith.constant 0 : i32
    %c0_i32_1 = arith.constant 0 : i32
    return %c0_i32, %c0_i32_0 : i32, i32
  }
  func.func @transform_5(%arg0: i32) -> (i32, i32) {
    %c0_i32 = arith.constant 0 : i32
    %c0_i32_0 = arith.constant 0 : i32
    %c0_i32_1 = arith.constant 0 : i32
    return %c0_i32, %c0_i32_0 : i32, i32
  }
  func.func @transform_6(%arg0: i32) -> (i32, i32) {
    %c0_i32 = arith.constant 0 : i32
    %c0_i32_0 = arith.constant 0 : i32
    %c0_i32_1 = arith.constant 0 : i32
    return %c0_i32, %c0_i32_0 : i32, i32
  }
  func.func @transform_7(%arg0: i32) -> (i32, i32) {
    %c0_i32 = arith.constant 0 : i32
    %c0_i32_0 = arith.constant 0 : i32
    return %arg0, %c0_i32 : i32, i32
  }
}

</mosaic_0001>

<bundles_post_ra>
// kernel: mynn_forward.1
= control target key start
LH: loop header
LB: loop body
LE: loop exit
PB: predicated region body
PF: predicated region fallthrough
CT: control target
= control target key end

     0   :  { %v1254_v42 = vmov 0.0   ;;  %vm1255_vm0 = vmmov 0   ;;  %s1576_s0 = inlined_call_operand.vmem [shape: bf16[8,896], index: 0, kind: input, shape index: {}]   ;;  %s1577_s1 = inlined_call_operand.vmem [shape: bf16[896,128], index: 1, kind: input, shape index: {}]   ;;  %s1578_s2 = inlined_call_operand.vmem [shape: f32[1,128], index: 2, kind: input, shape index: {}]   ;;  %s1579_s3 = inlined_call_operand.vmem [shape: bf16[128,128], index: 3, kind: input, shape index: {}]   ;;  %s1580_s4 = inlined_call_operand.vmem [shape: f32[1,128], index: 4, kind: input, shape index: {}]   ;;  %s1581_s5 = inlined_call_operand.vmem [shape: bf16[128,128], index: 5, kind: input, shape index: {}]   ;;  %s1582_s6 = inlined_call_operand.vmem [shape: f32[1,128], index: 6, kind: input, shape index: {}]   ;;  %s1583_s7 = inlined_call_operand.hbm [shape: f32[8,128], index: 7, kind: output, shape index: {}]  }
   0x1   :  { %v1151_v0 = vld [vmem:[%s1577_s1 + $0x40] sm:$0xff]   ;;  %v1155_v4 = vld [vmem:[%s1577_s1 + $0x48] sm:$0xff]   ;;  %v1159_v8 = vld [vmem:[%s1577_s1 + $0x50] sm:$0xff]  }
   0x2   :  { %v1152_v1 = vld [vmem:[%s1577_s1] sm:$0xff]   ;;  %995 = vmatprep.subr.bf16.mxu0 %v1151_v0  ;;  %v1156_v5 = vld [vmem:[%s1577_s1 + $0x8] sm:$0xff]   ;;  %v1160_v9 = vld [vmem:[%s1577_s1 + $0x10] sm:$0xff]  }
   0x3   :  { %v1153_v2 = vld [vmem:[%s1577_s1 + $0xc0] sm:$0xff]   ;;  %996 = vmatpush3.bf16.msra.mxu0 %v1152_v1  ;;  %v1157_v6 = vld [vmem:[%s1577_s1 + $0xc8] sm:$0xff]   ;;  %v1161_v10 = vld [vmem:[%s1577_s1 + $0xd0] sm:$0xff]  }
   0x4   :  { %v1154_v3 = vld [vmem:[%s1577_s1 + $0x80] sm:$0xff]   ;;  %1017 = vmatprep.subr.bf16.mxu1 %v1153_v2  ;;  %997 = vmatprep.subr.bf16.mxu0 %v1155_v4  ;;  %v1158_v7 = vld [vmem:[%s1577_s1 + $0x88] sm:$0xff]   ;;  %v1162_v11 = vld [vmem:[%s1577_s1 + $0x90] sm:$0xff]  }
   0x5   :  { %1018 = vmatpush3.bf16.msra.mxu1 %v1154_v3  ;;  %v1163_v12 = vld [vmem:[%s1577_s1 + $0x58] sm:$0xff]   ;;  %v1167_v16 = vld [vmem:[%s1577_s1 + $0x60] sm:$0xff]   ;;  %v1171_v20 = vld [vmem:[%s1577_s1 + $0x68] sm:$0xff]  }
   0x6   :  { %1019 = vmatprep.subr.bf16.mxu1 %v1157_v6  ;;  %v1164_v13 = vld [vmem:[%s1577_s1 + $0x18] sm:$0xff]   ;;  %v1168_v17 = vld [vmem:[%s1577_s1 + $0x20] sm:$0xff]   ;;  %v1172_v21 = vld [vmem:[%s1577_s1 + $0x28] sm:$0xff]  }
   0x7   :  { %998 = vmatpush3.bf16.msra.mxu0 %v1156_v5  ;;  %v1165_v14 = vld [vmem:[%s1577_s1 + $0xd8] sm:$0xff]   ;;  %v1169_v18 = vld [vmem:[%s1577_s1 + $0xe0] sm:$0xff]   ;;  %v1173_v22 = vld [vmem:[%s1577_s1 + $0xe8] sm:$0xff]  }
   0x8   :  { %999 = vmatprep.subr.bf16.mxu0 %v1159_v8  ;;  %v1166_v15 = vld [vmem:[%s1577_s1 + $0x98] sm:$0xff]   ;;  %v1170_v19 = vld [vmem:[%s1577_s1 + $0xa0] sm:$0xff]   ;;  %v1174_v23 = vld [vmem:[%s1577_s1 + $0xa8] sm:$0xff]  }
   0x9   :  { %1020 = vmatpush3.bf16.msra.mxu1 %v1158_v7  ;;  %v1175_v24 = vld [vmem:[%s1577_s1 + $0x70] sm:$0xff]   ;;  %v1179_v28 = vld [vmem:[%s1577_s1 + $0x78] sm:$0xff]   ;;  %v28_v31 = vld [vmem:[%s1576_s0] sm:$0xff] }
   0xa   :  { %1021 = vmatprep.subr.bf16.mxu1 %v1161_v10  ;;  %v1176_v25 = vld [vmem:[%s1577_s1 + $0x30] sm:$0xff]   ;;  %v1180_v29 = vld [vmem:[%s1577_s1 + $0x38] sm:$0xff]   ;;  %v914_v32 = vcombine.low %v28_v31, %v28_v31  ;;  %v915_v33 = vcombine.high %v28_v31, %v28_v31  ;;  %v1185_v35 = vld [vmem:[%s1577_s1 + $0x140] sm:$0xff]  }
   0xb   :  { %1000 = vmatpush3.bf16.msra.mxu0 %v1160_v9  ;;  %v1177_v26 = vld [vmem:[%s1577_s1 + $0xf0] sm:$0xff]   ;;  %v1181_v30 = vld [vmem:[%s1577_s1 + $0xf8] sm:$0xff]   ;;  %v29_v36 = vld [vmem:[%s1576_s0 + $0x8] sm:$0xff] }
   0xc   :  { %1001 = vmatprep.subr.bf16.mxu0 %v1163_v12  ;;  %v1178_v27 = vld [vmem:[%s1577_s1 + $0xb0] sm:$0xff]   ;;  %v1184_v34 = vld [vmem:[%s1577_s1 + $0xb8] sm:$0xff]   ;;  %544 = vmatprep.mubr.bf16.mxu0 %v915_v33  ;;  %v916_v37 = vcombine.low %v29_v36, %v29_v36  ;;  %v917_v38 = vcombine.high %v29_v36, %v29_v36  ;;  %v1188_v39 = vld [vmem:[%s1577_s1 + $0x100] sm:$0xff]  }
   0xd   :  { %1022 = vmatpush3.bf16.msra.mxu1 %v1162_v11  ;;  %v1189_v40 = vld [vmem:[%s1577_s1 + $0x180] sm:$0xff]   ;;  %v1190_v41 = vld [vmem:[%s1577_s1 + $0x148] sm:$0xff]   ;;  %v1193_v45 = vld [vmem:[%s1577_s1 + $0x150] sm:$0xff]  }
   0xe   :  { %1023 = vmatprep.subr.bf16.mxu1 %v1165_v14  ;;  %584 = vmatprep.mubr.bf16.mxu1 %v917_v38  ;;  %v1191_v43 = vld [vmem:[%s1577_s1 + $0x108] sm:$0xff]   ;;  %v1194_v46 = vld [vmem:[%s1577_s1 + $0x110] sm:$0xff]   ;;  %v1196_v48 = vld [vmem:[%s1577_s1 + $0x158] sm:$0xff]  }
   0xf   :  { %1002 = vmatpush3.bf16.msra.mxu0 %v1164_v13  ;;  %v1192_v44 = vld [vmem:[%s1577_s1 + $0x188] sm:$0xff]   ;;  %v1195_v47 = vld [vmem:[%s1577_s1 + $0x190] sm:$0xff]   ;;  %v1197_v49 = vld [vmem:[%s1577_s1 + $0x118] sm:$0xff]  }
  0x10   :  { %1003 = vmatprep.subr.bf16.mxu0 %v1167_v16  ;;  %v1199_v50 = vld [vmem:[%s1577_s1 + $0x160] sm:$0xff]   ;;  %v1198_v51 = vld [vmem:[%s1577_s1 + $0x198] sm:$0xff]   ;;  %v1202_v53 = vld [vmem:[%s1577_s1 + $0x168] sm:$0xff]  }
  0x11   :  { %1024 = vmatpush3.bf16.msra.mxu1 %v1166_v15  ;;  %v1200_v52 = vld [vmem:[%s1577_s1 + $0x120] sm:$0xff]   ;;  %v1203_v55 = vld [vmem:[%s1577_s1 + $0x128] sm:$0xff]   ;;  %v1205_v56 = vld [vmem:[%s1577_s1 + $0x170] sm:$0xff]  }
  0x12   :  { %1025 = vmatprep.subr.bf16.mxu1 %v1169_v18  ;;  %v1201_v54 = vld [vmem:[%s1577_s1 + $0x1a0] sm:$0xff]   ;;  %v1204_v57 = vld [vmem:[%s1577_s1 + $0x1a8] sm:$0xff]   ;;  %v1206_v58 = vld [vmem:[%s1577_s1 + $0x130] sm:$0xff]  }
  0x13   :  { %1004 = vmatpush3.bf16.msra.mxu0 %v1168_v17  ;;  %v30_v59 = vld [vmem:[%s1576_s0 + $0x10] sm:$0xff]  ;;  %v1208_v62 = vld [vmem:[%s1577_s1 + $0x178] sm:$0xff]  }
  0x14   :  { %1005 = vmatprep.subr.bf16.mxu0 %v1171_v20  ;;  %v1207_v60 = vld [vmem:[%s1577_s1 + $0x1b0] sm:$0xff]   ;;  %v919_v61 = vcombine.high %v30_v59, %v30_v59  ;;  %v1209_v63 = vld [vmem:[%s1577_s1 + $0x138] sm:$0xff]   ;;  %v918_v1 = vcombine.low %v30_v59, %v30_v59 }
  0x15   :  { %1026 = vmatpush3.bf16.msra.mxu1 %v1170_v19  ;;  %v1212_v0 = vld [vmem:[%s1577_s1 + $0x1b8] sm:$0xff]  }
  0x16   :  { %1027 = vmatprep.subr.bf16.mxu1 %v1173_v22  ;;  %v1213_v2 = vld [vmem:[%s1576_s0 + $0x18] ss:$0 sps:$4 sm:$0xff]  }
  0x17   :  { %1006 = vmatpush3.bf16.msra.mxu0 %v1172_v21 }
  0x18   :  { %1007 = vmatprep.subr.bf16.mxu0 %v1175_v24 }
  0x19   :  { %1028 = vmatpush3.bf16.msra.mxu1 %v1174_v23 }
  0x1a   :  { %1029 = vmatprep.subr.bf16.mxu1 %v1177_v26 }
  0x1b   :  { %1008 = vmatpush3.bf16.msra.mxu0 %v1176_v25 }
  0x1c   :  { %1009 = vmatprep.subr.bf16.mxu0 %v1179_v28 }
  0x1d   :  { %1030 = vmatpush3.bf16.msra.mxu1 %v1178_v27 }
  0x1e   :  { %1031 = vmatprep.subr.bf16.mxu1 %v1181_v30 }
  0x1f   :  { %1010 = vmatpush3.bf16.msra.mxu0 %v1180_v29 }
  0x20   :  { %1039 = vmatprep.subr.bf16.mxu0 %v1185_v35 }
  0x21   :  { %1032 = vmatpush3.bf16.msra.mxu1 %v1184_v34 }
  0x22   :  { %545 = vmatmul.mubr.bf16.vlgmr.msra.gmra.mrb[0].mxu0 %v914_v32  ;;  %1088 = vmatprep.subr.bf16.mxu1 %v1254_v42 }
  0x23   :  { %1040 = vmatpush3.bf16.msra.mxu0 %v1188_v39  ;;  %624 = vmatprep.mubr.bf16.mxu0 %v919_v61 }
  0x24   :  { %585 = vmatmul.mubr.bf16.vlgmr.msra.gmra.mrb[0].mxu1 %v916_v37  ;;  %1041 = vmatprep.subr.bf16.mxu0 %v1190_v41 }
  0x25   :  { %1089 = vmatpush3.bf16.msra.mxu1 %v1189_v40  ;;  %1104 = vmatprep.mubr.msk.bf16.mxu1 %vm1255_vm0, %v1254_v42 }
  0x26   :  { %1090 = vmatprep.subr.bf16.mxu1 %v1254_v42 }
  0x27   :  { %1042 = vmatpush3.bf16.msra.mxu0 %v1191_v43 }
  0x28   :  { %1043 = vmatprep.subr.bf16.mxu0 %v1193_v45 }
  0x29   :  { %1091 = vmatpush3.bf16.msra.mxu1 %v1192_v44 }
  0x2a   :  { %1092 = vmatprep.subr.bf16.mxu1 %v1254_v42 }
  0x2b   :  { %1044 = vmatpush3.bf16.msra.mxu0 %v1194_v46 }
  0x2c   :  { %1045 = vmatprep.subr.bf16.mxu0 %v1196_v48 }
  0x2d   :  { %1093 = vmatpush3.bf16.msra.mxu1 %v1195_v47 }
  0x2e   :  { %1094 = vmatprep.subr.bf16.mxu1 %v1254_v42 }
  0x2f   :  { %1046 = vmatpush3.bf16.msra.mxu0 %v1197_v49 }
  0x30   :  { %1047 = vmatprep.subr.bf16.mxu0 %v1199_v50 }
  0x31   :  { %1095 = vmatpush3.bf16.msra.mxu1 %v1198_v51 }
  0x32   :  { %1096 = vmatprep.subr.bf16.mxu1 %v1254_v42 }
  0x33   :  { %1048 = vmatpush3.bf16.msra.mxu0 %v1200_v52 }
  0x34   :  { %1049 = vmatprep.subr.bf16.mxu0 %v1202_v53 }
  0x35   :  { %1097 = vmatpush3.bf16.msra.mxu1 %v1201_v54 }
  0x36   :  { %1098 = vmatprep.subr.bf16.mxu1 %v1254_v42 }
  0x37   :  { %1050 = vmatpush3.bf16.msra.mxu0 %v1203_v55 }
  0x38   :  { %1051 = vmatprep.subr.bf16.mxu0 %v1205_v56 }
  0x39   :  { %1099 = vmatpush3.bf16.msra.mxu1 %v1204_v57 }
  0x3a   :  { %1100 = vmatprep.subr.bf16.mxu1 %v1254_v42 }
  0x3b   :  { %1052 = vmatpush3.bf16.msra.mxu0 %v1206_v58 }
  0x3c   :  { %1053 = vmatprep.subr.bf16.mxu0 %v1208_v62 }
  0x3d   :  { %1101 = vmatpush3.bf16.msra.mxu1 %v1207_v60 }
  0x3e   :  { %1102 = vmatprep.subr.bf16.mxu1 %v1254_v42 }
  0x3f   :  { %1054 = vmatpush3.bf16.msra.mxu0 %v1209_v63 }
  0x40   :  { %1108 = vmatprep.subr.bf16.mxu0 %v1254_v42 }
  0x41   :  { %1103 = vmatpush3.bf16.msra.mxu1 %v1212_v0 }
  0x42   :  { %625 = vmatmul.mubr.bf16.vlgmr.msra.gmra.mrb[4].mxu0 %v918_v1  ;;  %1128 = vmatprep.subr.bf16.mxu1 %v1254_v42 }
  0x43   :  { %1124 = vmatprep.mubr.msk.bf16.mxu0 %vm1255_vm0, %v1254_v42 }
  0x44   :  { %12 = vsyncpa [#allocation3], 0  ;;  %1105 = vmatmul.mubr.bf16.vlgmr.msra.gmra.mrb[4].mxu1 %v1213_v2  ;;  %v1214_v3 = vld [vmem:[%s1579_s3] sm:$0xff]   ;;  %v1215_v4 = vld [vmem:[%s1579_s3 + $0x8] sm:$0xff]   ;;  %s1256_s15 = smov [#allocation2]  }
  0x45   :  { %1144 = vmatprep.mubr.msk.bf16.mxu1 %vm1255_vm0, %v1254_v42  ;;  %1109 = vmatpush3.bf16.msra.mxu0 %v1214_v3  ;;  %v1216_v5 = vld [vmem:[%s1579_s3 + $0x10] sm:$0xff]   ;;  %v1217_v6 = vld [vmem:[%s1579_s3 + $0x18] sm:$0xff]   ;;  %v1218_v7 = vld [vmem:[%s1579_s3 + $0x20] sm:$0xff]   ;;  %s905_s16 = sshll.u32 %s1256_s15, 4  ;;  %s906_s16 = int_to_ptr.vmem [resolvable:$true] %s905_s16 }
  0x46   :  { %1110 = vmatprep.subr.bf16.mxu0 %v1254_v42  ;;  %v1219_v8 = vld [vmem:[%s1579_s3 + $0x28] sm:$0xff]   ;;  %v1220_v9 = vld [vmem:[%s1579_s3 + $0x30] sm:$0xff]   ;;  %v1221_v10 = vld [vmem:[%s1579_s3 + $0x38] sm:$0xff]   ;;  %p1235_p1 = scmp.lt.s32.totalorder %s906_s16, %s906_s16 }
  0x47   :  { %v1222_v11 = vld [vmem:[%s1581_s5] sm:$0xff]   ;;  %v1223_v12 = vld [vmem:[%s1581_s5 + $0x8] sm:$0xff]   ;;  %v1224_v13 = vld [vmem:[%s1581_s5 + $0x10] sm:$0xff]  }
  0x48   :  { %1129 = vmatpush3.bf16.msra.mxu1 %v1222_v11  ;;  %v1225_v14 = vld [vmem:[%s1581_s5 + $0x18] sm:$0xff]   ;;  %v1226_v15 = vld [vmem:[%s1581_s5 + $0x20] sm:$0xff]   ;;  %v1227_v16 = vld [vmem:[%s1581_s5 + $0x28] sm:$0xff]  }
  0x49   :  { %1111 = vmatpush3.bf16.msra.mxu0 %v1215_v4  ;;  %1130 = vmatprep.subr.bf16.mxu1 %v1254_v42  ;;  %v913_v18 = vld [vmem:[%s1578_s2] ss:$0 sm:$0xff]  ;;  %v1228_v44 = vld [vmem:[%s1581_s5 + $0x30] sm:$0xff]   ;;  %v1229_v45 = vld [vmem:[%s1581_s5 + $0x38] sm:$0xff]  }
  0x4a   :  { %1112 = vmatprep.subr.bf16.mxu0 %v1254_v42  ;;  %v977_v46 = vld [vmem:[%s1580_s4] ss:$0 sm:$0xff]  ;;  %s1230_s4 = scalar_lea.vmem %s906_s16, 128 }
  0x4b   :  { %p1231_p0 = scmp.ne.s32.totalorder %s906_s16, %s1230_s4  ;;  %p1236_p2 = scmp.lt.s32.totalorder %s1230_s4, %s1230_s4 }
  0x4c   :  { %1131 = vmatpush3.bf16.msra.mxu1 %v1223_v12 }
  0x4d   :  { %1113 = vmatpush3.bf16.msra.mxu0 %v1216_v5  ;;  %1132 = vmatprep.subr.bf16.mxu1 %v1254_v42  ;;  %p1237_p3 = por %p1236_p2, %p1235_p1 }
  0x4e   :  { %1114 = vmatprep.subr.bf16.mxu0 %v1254_v42 }
  0x4f   :  { %p1238_p4 = pnand %p1237_p3, %p1231_p0 }
  0x50   :  { %1133 = vmatpush3.bf16.msra.mxu1 %v1224_v13 }
  0x51   :  { %1115 = vmatpush3.bf16.msra.mxu0 %v1217_v6  ;;  %1134 = vmatprep.subr.bf16.mxu1 %v1254_v42 }
  0x52   :  { %1116 = vmatprep.subr.bf16.mxu0 %v1254_v42 }
  0x54   :  { %1135 = vmatpush3.bf16.msra.mxu1 %v1225_v14 }
  0x55   :  { %1117 = vmatpush3.bf16.msra.mxu0 %v1218_v7  ;;  %1136 = vmatprep.subr.bf16.mxu1 %v1254_v42 }
  0x56   :  { %1118 = vmatprep.subr.bf16.mxu0 %v1254_v42 }
  0x58   :  { %1137 = vmatpush3.bf16.msra.mxu1 %v1226_v15 }
  0x59   :  { %1119 = vmatpush3.bf16.msra.mxu0 %v1219_v8  ;;  %1138 = vmatprep.subr.bf16.mxu1 %v1254_v42 }
  0x5a   :  { %1120 = vmatprep.subr.bf16.mxu0 %v1254_v42 }
  0x5c   :  { %1139 = vmatpush3.bf16.msra.mxu1 %v1227_v16 }
  0x5d   :  { %1121 = vmatpush3.bf16.msra.mxu0 %v1220_v9  ;;  %1140 = vmatprep.subr.bf16.mxu1 %v1254_v42 }
  0x5e   :  { %1122 = vmatprep.subr.bf16.mxu0 %v1254_v42 }
  0x60   :  { %1141 = vmatpush3.bf16.msra.mxu1 %v1228_v44 }
  0x61   :  { %1123 = vmatpush3.bf16.msra.mxu0 %v1221_v10  ;;  %1142 = vmatprep.subr.bf16.mxu1 %v1254_v42  ;;  %v986_v42 = vld [vmem:[%s1582_s6] ss:$0 sm:$0xff] }
  0x64   :  { %1143 = vmatpush3.bf16.msra.mxu1 %v1229_v45 }
  0xf5   :  { %v1011_v17 = vpop.f32.mrb[0].mxu0 }
  0xf6   :  { %v1012_v19 = vpop.f32.mrb[1].mxu0 }
  0xf7   :  { %v1013_v20 = vadd.f32 %v1012_v19, %v1011_v17  ;;  %v1014_v21 = vpop.f32.mrb[2].mxu0  ;;  %v1033_v22 = vpop.f32.mrb[0].mxu1 }
  0xf8   :  { %v1015_v23 = vpop.f32.mrb[3].mxu0  ;;  %v1034_v24 = vpop.f32.mrb[1].mxu1 }
  0xf9   :  { %v547_v25 = vadd.f32 %v1013_v20, %v913_v18  ;;  %v1035_v26 = vadd.f32 %v1034_v24, %v1033_v22  ;;  %v1036_v27 = vpop.f32.mrb[2].mxu1 }
  0xfa   :  { %v1037_v28 = vpop.f32.mrb[3].mxu1 }
  0xfb   :  { %v587_v29 = vadd.f32 %v1035_v26, %v547_v25 }
 0x115   :  { %v1055_v30 = vpop.f32.mrb[4].mxu0 }
 0x116   :  { %v1056_v31 = vpop.f32.mrb[5].mxu0 }
 0x117   :  { %v1057_v32 = vadd.f32 %v1056_v31, %v1055_v30  ;;  %v1058_v33 = vpop.f32.mrb[6].mxu0  ;;  %v666_v34 = vpop.f32.mrb[4].mxu1 }
 0x118   :  { %v1059_v35 = vpop.f32.mrb[7].mxu0  ;;  %v1106_v36 = vpop.f32.mrb[5].mxu1 }
 0x119   :  { %v627_v37 = vadd.f32 %v1057_v32, %v587_v29  ;;  %v669_v38 = vpop.f32.mrb[6].mxu1 }
 0x11a   :  { %v1107_v39 = vpop.f32.mrb[7].mxu1 }
 0x11b   :  { %v667_v40 = vadd.f32 %v666_v34, %v627_v37 }
 0x11d   :  { %v672_v41 = vmax.f32 %v667_v40, 0.0 }
 0x11f   :  { %v673_v43 = vpack.c.bf16 %v672_v41, %v672_v41 }
 0x121   :  { %1125 = vmatmul.mubr.bf16.vlgmr.msra.gmra.mrb[8].mxu0 %v673_v43 }
 0x1f4   :  { %v779_v47 = vpop.f32.mrb[8].mxu0 }
 0x1f5   :  { %v780_v48 = vadd.f32 %v977_v46, %v779_v47  ;;  %v1126_v49 = vpop.f32.mrb[9].mxu0 }
 0x1f6   :  { %v782_v50 = vpop.f32.mrb[10].mxu0 }
 0x1f7   :  { %v785_v51 = vmax.f32 %v780_v48, 0.0  ;;  %v1127_v52 = vpop.f32.mrb[11].mxu0 }
 0x1f9   :  { %v786_v53 = vpack.c.bf16 %v785_v51, %v785_v51 }
 0x1fb   :  { %1145 = vmatmul.mubr.bf16.vlgmr.msra.gmra.mrb[8].mxu1 %v786_v53 }
 0x2ce   :  { %v892_v54 = vpop.f32.mrb[8].mxu1 }
 0x2cf   :  { %v893_v55 = vadd.f32 %v986_v42, %v892_v54  ;;  %v1146_v56 = vpop.f32.mrb[9].mxu1 }
 0x2d0   :  { %v895_v57 = vpop.f32.mrb[10].mxu1 }
 0x2d1   :  { %898 = vst [vmem:[#allocation2] sm:$0xff] %v893_v55  ;;  %v1147_v58 = vpop.f32.mrb[11].mxu1 }
 0x2d2   :  { %1241 = shalt.err (!%p1238_p4)
}
 0x2d3   :  { %s1242_s6 = scalar_lea.hbm %s1583_s7, 128 }
 0x2d4   :  { %p1243_p5 = scmp.ne.s32.totalorder %s1583_s7, %s1242_s6  ;;  %p1246_p6 = scmp.lt.u32.totalorder %s1242_s6, %s1583_s7 }
 0x2d6   :  { %p1248_p7 = pnand %p1246_p6, %p1243_p5 }
 0x2d8   :  { %1251 = shalt.err (!%p1248_p7)
}
 0x2d9   :  { %908 = dma.vmem_to_hbm [thread:$0]  %s906_s16, 128, %s1583_s7, [#allocation3]  }
 0x2da   :  { %1252 = dma.done.wait [#allocation3], 128  }
 0x2db   :  { %1253 = vsyncadd [#allocation3], 4294967168 }
 0x2dc   :  { %912 = vsyncpa [#allocation3], 1 }

</bundles_post_ra>
